<compile_context>
chip_gen: v5e
topology: v5e:2x2
jax: 0.10.0
libtpu: 0.0.40
codegen_flags: <defaults>
</compile_context>

<pallas_src>
import numpy as np
import jax
import jax.numpy as jnp
from jax.experimental import pallas as pl
from jax.experimental.pallas import tpu as pltpu


def _make_ghmc_kernel(bins: int, bins_pad: int, n_rows: int, tile_rows: int,
                      mask_rows: bool, loss_weight: float):
    """Build the GHMC kernel for statically-known bins / tiling."""

    def kernel(predo_ref, target_ref, out_ref, hist_ref, cesum_ref):
        # predo_ref : VMEM (TN, C)        logits (native dtype)
        # target_ref: VMEM (TN, 1) int32  class ids
        # out_ref   : VMEM (1, 1)  f32    scalar loss (written on last step)
        # hist_ref  : VMEM (1, BINS_PAD)  per-bin row counts (accumulator)
        # cesum_ref : VMEM (1, BINS_PAD)  per-bin sum of CE   (accumulator)
        t = pl.program_id(0)

        @pl.when(t == 0)
        def _init():
            hist_ref[...] = jnp.zeros_like(hist_ref)
            cesum_ref[...] = jnp.zeros_like(cesum_ref)

        x = predo_ref[...].astype(jnp.float32)              # (TN, C)
        tgt = target_ref[...]                               # (TN, 1) int32
        TN, C = x.shape

        # one-hot(target) via iota-compare (no gather)
        col = jax.lax.broadcasted_iota(jnp.int32, (TN, C), 1)
        onehot = col == tgt                                  # bool (TN, C)

        # numerically-stable softmax pieces (only what is needed)
        m = jnp.max(x, axis=1, keepdims=True)                # (TN, 1)
        z = x - m
        e = jnp.exp(z)
        s = jnp.sum(e, axis=1, keepdims=True)                # (TN, 1)
        z_t = jnp.sum(jnp.where(onehot, z, 0.0), axis=1, keepdims=True)  # (TN, 1)

        # CrossEntropy(reduction='none') = logsumexp(x) - x[target]
        ce = jnp.log(s) - z_t                                # (TN, 1)

        # g = | p_t - 1 |  with p_t = exp(z_t) / s  (no (N,C) divide)
        p_t = jnp.exp(z_t) / s                               # (TN, 1)
        g = jnp.abs(p_t - 1.0)                               # (TN, 1)

        # arithmetic bin assignment (uniform edges i/bins, clamp = top fudge)
        bin_idx = jnp.floor(g * float(bins)).astype(jnp.int32)
        bin_idx = jnp.minimum(bin_idx, bins - 1)             # (TN, 1)

        if mask_rows:
            # padded rows -> bin -1 (matches no lane below)
            row = t * tile_rows + jax.lax.broadcasted_iota(jnp.int32, (TN, 1), 0)
            bin_idx = jnp.where(row < n_rows, bin_idx, -1)

        # lane-dense one-hot over bins; one pass builds both accumulators
        lane = jax.lax.broadcasted_iota(jnp.int32, (TN, bins_pad), 1)
        bin_onehot = (lane == bin_idx).astype(jnp.float32)   # (TN, BINS_PAD)

        hist_ref[...] += jnp.sum(bin_onehot, axis=0, keepdims=True)
        cesum_ref[...] += jnp.sum(bin_onehot * ce, axis=0, keepdims=True)

        @pl.when(t == pl.num_programs(0) - 1)
        def _finalize():
            counts = hist_ref[...]                           # (1, BINS_PAD)
            blane = jax.lax.broadcasted_iota(jnp.int32, (1, bins_pad), 1)
            valid = (blane < bins) & (counts > 0.0)
            n_valid = jnp.sum(valid.astype(jnp.float32), axis=1, keepdims=True)
            inv_counts = jnp.where(valid, 1.0 / jnp.maximum(counts, 1.0), 0.0)
            total = jnp.sum(cesum_ref[...] * inv_counts, axis=1, keepdims=True)
            loss = jnp.where(n_valid > 0.0,
                             total / jnp.maximum(n_valid, 1.0),
                             jnp.zeros_like(total)) * loss_weight
            out_ref[...] = loss                              # (1, 1)

    return kernel


def ghmc_loss(predo, target, epoch, batch, loss_weight=1.0, block_rows=512):
    """Pallas implementation of GHMC.forward(predo, target, epoch, batch)."""
    # bins depends only on Python scalars epoch & batch -> static per call.
    bins = int(40 ** (((epoch - 1) * 100 + batch + 1) / 20000))
    bins_pad = ((bins + 127) // 128) * 128                   # lane-dense pad

    N, C = predo.shape
    block_rows = max(8, (int(block_rows) // 8) * 8)
    TN = block_rows if N >= block_rows else max(8, ((N + 7) // 8) * 8)
    n_pad = (-N) % TN
    num_tiles = (N + n_pad) // TN

    target2d = target.astype(jnp.int32).reshape(N, 1)
    if n_pad:
        predo_p = jnp.pad(predo, ((0, n_pad), (0, 0)))       # zero logits -> finite CE
        target_p = jnp.pad(target2d, ((0, n_pad), (0, 0)))   # class 0 (masked anyway)
    else:
        predo_p, target_p = predo, target2d

    kernel = _make_ghmc_kernel(bins, bins_pad, N, TN, n_pad > 0, float(loss_weight))

    out = pl.pallas_call(
        kernel,
        out_shape=jax.ShapeDtypeStruct((1, 1), jnp.float32),
        grid_spec=pltpu.PrefetchScalarGridSpec(
            num_scalar_prefetch=0,
            grid=(num_tiles,),
            in_specs=[
                pl.BlockSpec((TN, C), lambda t: (t, 0)),     # logits tile
                pl.BlockSpec((TN, 1), lambda t: (t, 0)),     # target tile
            ],
            out_specs=pl.BlockSpec((1, 1), lambda t: (0, 0)),
            scratch_shapes=[
                pltpu.VMEM((1, bins_pad), jnp.float32),      # per-bin counts
                pltpu.VMEM((1, bins_pad), jnp.float32),      # per-bin CE sums
            ],
        ),
        compiler_params=pltpu.CompilerParams(
            dimension_semantics=("arbitrary",)),
    )(predo_p, target_p)
    return out[0, 0]


def ghmc_loss_ref(predo, target, epoch, batch, loss_weight=1.0):
    """Pure-JAX reference mirroring the PyTorch semantics."""
    bins = int(40 ** (((epoch - 1) * 100 + batch + 1) / 20000))
    edges = np.arange(bins + 1, dtype=np.float32) / bins
    edges[-1] += 1e-6
    N = predo.shape[0]
    pred = jax.nn.softmax(predo.astype(jnp.float32), axis=1)
    p_t = pred[jnp.arange(N), target]
    g = jnp.abs(p_t - 1.0)
    weights = jnp.zeros_like(g)
    n = jnp.float32(0.0)
    for i in range(bins):
        inds = (g >= edges[i]) & (g < edges[i + 1])
        num = jnp.sum(inds.astype(jnp.float32))
        weights = jnp.where(inds & (num > 0), 1.0 / jnp.maximum(num, 1.0), weights)
        n = n + (num > 0).astype(jnp.float32)
    weights = jnp.where(n > 0, weights / jnp.maximum(n, 1.0), weights)
    logz = jax.nn.logsumexp(predo.astype(jnp.float32), axis=1)
    ce = logz - predo.astype(jnp.float32)[jnp.arange(N), target]
    return jnp.sum(ce * weights) * loss_weight


if __name__ == "__main__":
    key = jax.random.PRNGKey(0)
    k1, k2 = jax.random.split(key)

    N, C = 24, 8                      # small batch of 24 samples, 8 classes
    predo = jax.random.normal(k1, (N, C), dtype=jnp.float32)
    target = jax.random.randint(k2, (N,), 0, C, dtype=jnp.int32)
    epoch, batch = 92, 99             # -> bins = 5 (static per call)

    # block_rows=16 with N=24 -> 2 grid tiles + 8 padded (masked) rows, so the
    # grid accumulation, row masking and finalize paths are all exercised.
    loss = ghmc_loss(predo, target, epoch, batch, loss_weight=1.0, block_rows=16)
    loss = jax.block_until_ready(loss)

    ref = jax.block_until_ready(ghmc_loss_ref(predo, target, epoch, batch, 1.0))
    np.testing.assert_allclose(np.asarray(loss), np.asarray(ref),
                               rtol=1e-4, atol=1e-4)

    print("KERNEL_OK")
</pallas_src>

<mosaic_0001>
module attributes {stable_mosaic.version = 11 : i64} {
  func.func @kernel(%arg0: i32, %arg1: memref<16x8xf32, #tpu.memory_space<vmem>>, %arg2: memref<16x1xi32, #tpu.memory_space<vmem>>, %arg3: memref<1x1xf32, #tpu.memory_space<vmem>>, %arg4: memref<1x128xf32, #tpu.memory_space<vmem>>, %arg5: memref<1x128xf32, #tpu.memory_space<vmem>>) attributes {dimension_semantics = [#tpu.dimension_semantics<arbitrary>], iteration_bounds = array<i64: 2>, scalar_prefetch = 0 : i64, scratch_operands = 2 : i64, tpu.core_type = #tpu.core_type<tc>, window_params = [{transform_indices = @transform_0, window_bounds = array<i64: 16, 8>}, {transform_indices = @transform_1, window_bounds = array<i64: 16, 1>}, {pipeline_mode = #tpu.pipeline_mode<synchronous>, transform_indices = @transform_2, window_bounds = array<i64: 1, 1>}]} {
    %c0_i32 = arith.constant 0 : i32
    %0 = arith.cmpi eq, %arg0, %c0_i32 : i32
    %1 = arith.extui %0 : i1 to i32
    %c0_i32_0 = arith.constant 0 : i32
    %2 = arith.cmpi ne, %1, %c0_i32_0 : i32
    scf.if %2 {
      %cst_20 = arith.constant 0.000000e+00 : f32
      %60 = vector.broadcast %cst_20 : f32 to vector<1x128xf32>
      %c0_21 = arith.constant 0 : index
      %c0_22 = arith.constant 0 : index
      %61 = vector.load %arg4[%c0_21, %c0_22] : memref<1x128xf32, #tpu.memory_space<vmem>>, vector<1x128xf32>
      tpu.vector_store %arg4[%c0_21, %c0_22], %60 {strides = array<i32>} : memref<1x128xf32, #tpu.memory_space<vmem>>, vector<1x128xf32>,
      %cst_23 = arith.constant 0.000000e+00 : f32
      %62 = vector.broadcast %cst_23 : f32 to vector<1x128xf32>
      %c0_24 = arith.constant 0 : index
      %c0_25 = arith.constant 0 : index
      %63 = vector.load %arg5[%c0_24, %c0_25] : memref<1x128xf32, #tpu.memory_space<vmem>>, vector<1x128xf32>
      tpu.vector_store %arg5[%c0_24, %c0_25], %62 {strides = array<i32>} : memref<1x128xf32, #tpu.memory_space<vmem>>, vector<1x128xf32>,
    } else {
    }
    %c0 = arith.constant 0 : index
    %c0_1 = arith.constant 0 : index
    %3 = vector.load %arg1[%c0, %c0_1] : memref<16x8xf32, #tpu.memory_space<vmem>>, vector<16x8xf32>
    %c0_2 = arith.constant 0 : index
    %c0_3 = arith.constant 0 : index
    %4 = vector.load %arg2[%c0_2, %c0_3] : memref<16x1xi32, #tpu.memory_space<vmem>>, vector<16x1xi32>
    %5 = tpu.iota {dimensions = array<i32: 1>} : vector<16x8xi32>
    %6 = vector.broadcast %4 : vector<16x1xi32> to vector<16x8xi32>
    %7 = arith.cmpi eq, %5, %6 : vector<16x8xi32>
    %cst = arith.constant dense<0xFF800000> : vector<16xf32>
    %8 = vector.multi_reduction <maximumf>, %3, %cst [1] : vector<16x8xf32> to vector<16xf32>
    %9 = vector.shape_cast %8 : vector<16xf32> to vector<16x1xf32>
    %10 = vector.broadcast %9 : vector<16x1xf32> to vector<16x8xf32>
    %11 = arith.subf %3, %10 : vector<16x8xf32>
    %12 = math.exp %11 : vector<16x8xf32>
    %cst_4 = arith.constant dense<0.000000e+00> : vector<16xf32>
    %13 = vector.multi_reduction <add>, %12, %cst_4 [1] : vector<16x8xf32> to vector<16xf32>
    %14 = vector.shape_cast %13 : vector<16xf32> to vector<16x1xf32>
    %cst_5 = arith.constant 0.000000e+00 : f32
    %15 = vector.broadcast %cst_5 : f32 to vector<16x8xf32>
    %16 = arith.select %7, %11, %15 : vector<16x8xi1>, vector<16x8xf32>
    %cst_6 = arith.constant dense<0.000000e+00> : vector<16xf32>
    %17 = vector.multi_reduction <add>, %16, %cst_6 [1] : vector<16x8xf32> to vector<16xf32>
    %18 = vector.shape_cast %17 : vector<16xf32> to vector<16x1xf32>
    %19 = math.log %14 : vector<16x1xf32>
    %20 = arith.subf %19, %18 : vector<16x1xf32>
    %21 = math.exp %18 : vector<16x1xf32>
    %22 = arith.divf %21, %14 : vector<16x1xf32>
    %cst_7 = arith.constant 1.000000e+00 : f32
    %23 = vector.broadcast %cst_7 : f32 to vector<16x1xf32>
    %24 = arith.subf %22, %23 : vector<16x1xf32>
    %25 = math.absf %24 : vector<16x1xf32>
    %cst_8 = arith.constant 5.000000e+00 : f32
    %26 = vector.broadcast %cst_8 : f32 to vector<16x1xf32>
    %27 = arith.mulf %25, %26 : vector<16x1xf32>
    %28 = math.floor %27 : vector<16x1xf32>
    %29 = arith.fptosi %28 : vector<16x1xf32> to vector<16x1xi32>
    %c4_i32 = arith.constant 4 : i32
    %30 = vector.broadcast %c4_i32 : i32 to vector<16x1xi32>
    %31 = arith.minsi %29, %30 : vector<16x1xi32>
    %c16_i32 = arith.constant 16 : i32
    %32 = arith.muli %arg0, %c16_i32 : i32
    %33 = tpu.iota {dimensions = array<i32: 0>} : vector<16x1xi32>
    %34 = vector.broadcast %32 : i32 to vector<16x1xi32>
    %35 = arith.addi %34, %33 : vector<16x1xi32>
    %c24_i32 = arith.constant 24 : i32
    %36 = vector.broadcast %c24_i32 : i32 to vector<16x1xi32>
    %37 = arith.cmpi slt, %35, %36 : vector<16x1xi32>
    %c-1_i32 = arith.constant -1 : i32
    %38 = vector.broadcast %c-1_i32 : i32 to vector<16x1xi32>
    %39 = arith.select %37, %31, %38 : vector<16x1xi1>, vector<16x1xi32>
    %40 = tpu.iota {dimensions = array<i32: 1>} : vector<16x128xi32>
    %41 = vector.broadcast %39 : vector<16x1xi32> to vector<16x128xi32>
    %42 = arith.cmpi eq, %40, %41 : vector<16x128xi32>
    %43 = arith.extui %42 : vector<16x128xi1> to vector<16x128xi32>
    %44 = arith.sitofp %43 : vector<16x128xi32> to vector<16x128xf32>
    %c0_9 = arith.constant 0 : index
    %c0_10 = arith.constant 0 : index
    %45 = vector.load %arg4[%c0_9, %c0_10] : memref<1x128xf32, #tpu.memory_space<vmem>>, vector<1x128xf32>
    %cst_11 = arith.constant dense<0.000000e+00> : vector<128xf32>
    %46 = vector.multi_reduction <add>, %44, %cst_11 [0] : vector<16x128xf32> to vector<128xf32>
    %47 = vector.shape_cast %46 : vector<128xf32> to vector<1x128xf32>
    %48 = arith.addf %45, %47 : vector<1x128xf32>
    %c0_12 = arith.constant 0 : index
    %c0_13 = arith.constant 0 : index
    %49 = vector.load %arg4[%c0_12, %c0_13] : memref<1x128xf32, #tpu.memory_space<vmem>>, vector<1x128xf32>
    tpu.vector_store %arg4[%c0_12, %c0_13], %48 {strides = array<i32>} : memref<1x128xf32, #tpu.memory_space<vmem>>, vector<1x128xf32>,
    %c0_14 = arith.constant 0 : index
    %c0_15 = arith.constant 0 : index
    %50 = vector.load %arg5[%c0_14, %c0_15] : memref<1x128xf32, #tpu.memory_space<vmem>>, vector<1x128xf32>
    %51 = vector.broadcast %20 : vector<16x1xf32> to vector<16x128xf32>
    %52 = arith.mulf %44, %51 : vector<16x128xf32>
    %cst_16 = arith.constant dense<0.000000e+00> : vector<128xf32>
    %53 = vector.multi_reduction <add>, %52, %cst_16 [0] : vector<16x128xf32> to vector<128xf32>
    %54 = vector.shape_cast %53 : vector<128xf32> to vector<1x128xf32>
    %55 = arith.addf %50, %54 : vector<1x128xf32>
    %c0_17 = arith.constant 0 : index
    %c0_18 = arith.constant 0 : index
    %56 = vector.load %arg5[%c0_17, %c0_18] : memref<1x128xf32, #tpu.memory_space<vmem>>, vector<1x128xf32>
    tpu.vector_store %arg5[%c0_17, %c0_18], %55 {strides = array<i32>} : memref<1x128xf32, #tpu.memory_space<vmem>>, vector<1x128xf32>,
    %c1_i32 = arith.constant 1 : i32
    %57 = arith.cmpi eq, %arg0, %c1_i32 : i32
    %58 = arith.extui %57 : i1 to i32
    %c0_i32_19 = arith.constant 0 : i32
    %59 = arith.cmpi ne, %58, %c0_i32_19 : i32
    scf.if %59 {
      %c0_20 = arith.constant 0 : index
      %c0_21 = arith.constant 0 : index
      %60 = vector.load %arg4[%c0_20, %c0_21] : memref<1x128xf32, #tpu.memory_space<vmem>>, vector<1x128xf32>
      %61 = tpu.iota {dimensions = array<i32: 1>} : vector<1x128xi32>
      %c5_i32 = arith.constant 5 : i32
      %62 = vector.broadcast %c5_i32 : i32 to vector<1x128xi32>
      %63 = arith.cmpi slt, %61, %62 : vector<1x128xi32>
      %cst_22 = arith.constant 0.000000e+00 : f32
      %64 = vector.broadcast %cst_22 : f32 to vector<1x128xf32>
      %65 = arith.cmpf ogt, %60, %64 : vector<1x128xf32>
      %66 = arith.andi %63, %65 : vector<1x128xi1>
      %67 = arith.extui %66 : vector<1x128xi1> to vector<1x128xi32>
      %68 = arith.sitofp %67 : vector<1x128xi32> to vector<1x128xf32>
      %cst_23 = arith.constant dense<0.000000e+00> : vector<1xf32>
      %69 = vector.multi_reduction <add>, %68, %cst_23 [1] : vector<1x128xf32> to vector<1xf32>
      %70 = vector.shape_cast %69 : vector<1xf32> to vector<1x1xf32>
      %cst_24 = arith.constant 1.000000e+00 : f32
      %71 = vector.broadcast %cst_24 : f32 to vector<1x128xf32>
      %72 = arith.maximumf %60, %71 : vector<1x128xf32>
      %cst_25 = arith.constant 1.000000e+00 : f32
      %73 = vector.broadcast %cst_25 : f32 to vector<1x128xf32>
      %74 = arith.divf %73, %72 : vector<1x128xf32>
      %cst_26 = arith.constant 0.000000e+00 : f32
      %75 = vector.broadcast %cst_26 : f32 to vector<1x128xf32>
      %76 = arith.select %66, %74, %75 : vector<1x128xi1>, vector<1x128xf32>
      %c0_27 = arith.constant 0 : index
      %c0_28 = arith.constant 0 : index
      %77 = vector.load %arg5[%c0_27, %c0_28] : memref<1x128xf32, #tpu.memory_space<vmem>>, vector<1x128xf32>
      %78 = arith.mulf %77, %76 : vector<1x128xf32>
      %cst_29 = arith.constant dense<0.000000e+00> : vector<1xf32>
      %79 = vector.multi_reduction <add>, %78, %cst_29 [1] : vector<1x128xf32> to vector<1xf32>
      %80 = vector.shape_cast %79 : vector<1xf32> to vector<1x1xf32>
      %cst_30 = arith.constant 0.000000e+00 : f32
      %81 = vector.broadcast %cst_30 : f32 to vector<1x1xf32>
      %82 = arith.cmpf ogt, %70, %81 : vector<1x1xf32>
      %cst_31 = arith.constant 1.000000e+00 : f32
      %83 = vector.broadcast %cst_31 : f32 to vector<1x1xf32>
      %84 = arith.maximumf %70, %83 : vector<1x1xf32>
      %85 = arith.divf %80, %84 : vector<1x1xf32>
      %cst_32 = arith.constant 0.000000e+00 : f32
      %86 = vector.broadcast %cst_32 : f32 to vector<1x1xf32>
      %87 = arith.select %82, %85, %86 : vector<1x1xi1>, vector<1x1xf32>
      %cst_33 = arith.constant 1.000000e+00 : f32
      %88 = vector.broadcast %cst_33 : f32 to vector<1x1xf32>
      %89 = arith.mulf %87, %88 : vector<1x1xf32>
      %c0_34 = arith.constant 0 : index
      %c0_35 = arith.constant 0 : index
      %90 = vector.load %arg3[%c0_34, %c0_35] : memref<1x1xf32, #tpu.memory_space<vmem>>, vector<1x1xf32>
      tpu.vector_store %arg3[%c0_34, %c0_35], %89 {strides = array<i32>} : memref<1x1xf32, #tpu.memory_space<vmem>>, vector<1x1xf32>,
    } else {
    }
    return
  }
  func.func @transform_0(%arg0: i32) -> (i32, i32) {
    %c0_i32 = arith.constant 0 : i32
    %c0_i32_0 = arith.constant 0 : i32
    return %arg0, %c0_i32 : i32, i32
  }
  func.func @transform_1(%arg0: i32) -> (i32, i32) {
    %c0_i32 = arith.constant 0 : i32
    %c0_i32_0 = arith.constant 0 : i32
    return %arg0, %c0_i32 : i32, i32
  }
  func.func @transform_2(%arg0: i32) -> (i32, i32) {
    %c0_i32 = arith.constant 0 : i32
    %c0_i32_0 = arith.constant 0 : i32
    %c0_i32_1 = arith.constant 0 : i32
    return %c0_i32, %c0_i32_0 : i32, i32
  }
}

</mosaic_0001>

<bundles_post_ra>
// kernel: tpu_custom_call.1
= control target key start
LH: loop header
LB: loop body
LE: loop exit
PB: predicated region body
PF: predicated region fallthrough
CT: control target
= control target key end

     0   :  { %7 = vsyncpa [#allocation5], 0  ;;  %s535_s9 = smov 0   ;;  %s595_s0 = inlined_call_operand.vmem [shape: f32[32,8], index: 0, kind: input, shape index: {}]   ;;  %s596_s1 = inlined_call_operand.vmem [shape: s32[32,1], index: 1, kind: input, shape index: {}]   ;;  %s597_s2 = inlined_call_operand.hbm [shape: f32[1,1], index: 2, kind: output, shape index: {}]  }
   0x1 LB: > { %s541_s10 = sadd.s32 4294967295, %s513_s9   ;;  %p413_p0 = scmp.ge.s32.totalorder %s513_s9, 1  ;;  %s513_s9 = sphi %s535_s9, %s13_s9  }
   0x2   : > { %p120_p1 = scmp.lt.s32.totalorder %s513_s9, 3 }
   0x4   : > { %p121_p2 = pnand %p413_p0, %p120_p1 }
   0x5   : > { %s414_s11 = sshll.u32 (!%p121_p2), %s541_s10, 1  ;;  %p418_p4 = scmp.ne.s32.totalorder (!%p121_p2), %s541_s10, 0 }
   0x6   : > { %124 = sbr.rel (%p121_p2) target bundleno = 479 (0x1df), region = 28  ;;  %p143_p3 = scmp.lt.s32.totalorder (!%p121_p2), %s414_s11, 3 }
   0xb   : > { %s601_s11 = smov (!%p143_p3, %s414_s11), 3  ;;  %157 = sbr.rel (%p418_p4) target bundleno = 19 (0x13), region = 32 }
   0xc   : > { %s415_s12 = sshll.u32 %s601_s11, 3 }
   0xd   : > { %s146_s15 = scalar_lea.vmem %s595_s0, %s415_s12  ;;  %s152_s18 = scalar_lea.vmem %s596_s1, %s415_s12 }
  0x10   : > { %v515_v0 = vmov 0.0  }
  0x11   : > { %158 = vst [vmem:[#allocation2] sm:$0x1] %v515_v0 }
  0x12   : > { %159 = vst [vmem:[#allocation3] sm:$0x1] %v515_v0 }
  0x13 PF: > { %v160_v1 = vld [vmem:[%s146_s15] sm:$0xff]  ;;  %vm174_vm0 = vcmask 64512   ;;  %v516_v4 = vmov 0   ;;  %v161_v5 = vld [vmem:[%s146_s15 + $0x8] sm:$0xff]  ;;  %v164_v8 = vlaneseq  ;;  %s421_s19 = sshll.u32 %s541_s10, 4  ;;  %p424_p5 = scmp.ne.s32.totalorder %s541_s10, 1 }
  0x14   : > { %v162_v2 = vld [vmem:[%s152_s18] sm:$0xff]  ;;  %v175_v3 = vsel %vm174_vm0, %v160_v1, -inf  ;;  %453 = vset.pattern.permute.xlu1 %v516_v4  ;;  %454 = vset.pattern.permute.xlu0 %v516_v4  ;;  %v178_v6 = vsel %vm174_vm0, %v161_v5, -inf  ;;  %v163_v7 = vld [vmem:[%s152_s18 + $0x8] sm:$0xff]  ;;  %v259_v55 = vstv %s421_s19 }
  0x15   : > { %176 = vmax.xlane.f32.xlu0 %v175_v3  ;;  %167 = vperm.xlu1 %453, %v162_v2   ;;  %v556_v9 = vand.u32 127, %v164_v8  ;;  %v257_v53 = vshrl.u32 %v164_v8, 7 }
  0x17   : > { %v260_v62 = vadd.s32 %v259_v55, %v257_v53  ;;  %v258_v63 = vadd.s32 8, %v257_v53 }
  0x19   : > { %vm262_vm12 = vcmp.lt.s32.totalorder %v260_v62, 24  ;;  %v261_v4 = vadd.s32 %v259_v55, %v258_v63 }
  0x1b   : > { %vm263_vm13 = vcmp.lt.s32.totalorder %v261_v4, 24 }
  0x1d   : > { %179 = vmax.xlane.f32.xlu0 %v178_v6  ;;  %170 = vperm.xlu1 %453, %v163_v7  }
  0x87   : > { %v168_v10 = vpop.permute.xlu1 %167 }
  0x88   : > { %v177_v11 = vpop.xlane.xlu0 %176  ;;  %vm172_vm1 = vcmp.eq.s32.totalorder %v556_v9, %v168_v10 }
  0x89   : > { %v181_v12 = vsub.f32 %v160_v1, %v177_v11 }
  0x8b   : > { %v183_v13 = vmul.f32 1.442695, %v181_v12  ;;  %v193_v14 = vsel %vm172_vm1, %v181_v12, 0.0 }
  0x8c   : > { %v195_v15 = vsel %vm174_vm0, %v193_v14, 0.0 }
  0x8d   : > { %455 = vpow2.f32 %v183_v13  ;;  %196 = vadd.xlane.f32.xlu0 %v195_v15 }
  0x8f   : > { %v171_v16 = vpop.permute.xlu1 %170 }
  0x90   : > { %v180_v17 = vpop.xlane.xlu0 %179  ;;  %vm173_vm2 = vcmp.eq.s32.totalorder %v556_v9, %v171_v16  ;;  %v517_v16 = vmov 0.0  }
  0x91   : > { %v182_v18 = vsub.f32 %v161_v5, %v180_v17 }
  0x93   : > { %v456_v19 = vpop.eup %455  ;;  %v185_v20 = vmul.f32 1.442695, %v182_v18  ;;  %v194_v21 = vsel %vm173_vm2, %v182_v18, 0.0 }
  0x94   : > { %v187_v22 = vsel %vm174_vm0, %v456_v19, 0.0  ;;  %v198_v23 = vsel %vm174_vm0, %v194_v21, 0.0 }
  0x95   : > { %457 = vpow2.f32 %v185_v20  ;;  %188 = vadd.xlane.f32.xlu2 %v187_v22  ;;  %199 = vadd.xlane.f32.xlu1 %v198_v23 }
  0x9b   : > { %v458_v24 = vpop.eup %457 }
  0x9c   : > { %v190_v25 = vsel %vm174_vm0, %v458_v24, 0.0 }
  0x9d   : > { %191 = vadd.xlane.f32.xlu2 %v190_v25 }
 0x100   : > { %v564_v27 = vpop.xlane.xlu0 %196 }
 0x101   : > { %v207_v29 = vmul.f32 1.442695, %v564_v27 }
 0x108   : > { %v189_v26 = vpop.xlane.xlu2 %188  ;;  %v567_v36 = vpop.xlane.xlu1 %199 }
 0x109   : > { %459 = vrcp.f32 %v189_v26  ;;  %v222_v33 = vand.u32 2147483648, %v189_v26  ;;  %v220_v35 = vand.u32 2147483647, %v189_v26  ;;  %vm216_vm4 = vweird.f32 %v189_v26 }
 0x10a   : > { %v209_v40 = vmul.f32 1.442695, %v567_v36 }
 0x10b   : > { %v223_v39 = vor.u32 1.1754944e-38, %v222_v33  ;;  %vm221_vm6 = vcmp.eq.f32.partialorder %v220_v35, 8.507059e+37  ;;  %v272_v35 = vld [vmem:[#allocation2] sm:$0x1] }
 0x10f   : > { %v460_v28 = vpop.eup %459 }
 0x110   : > { %v192_v30 = vpop.xlane.xlu2 %191  ;;  %v212_v31 = vmul.f32 %v460_v28, %v189_v26  ;;  %vm217_vm3 = vweird.f32 %v460_v28 }
 0x111   : > { %461 = vrcp.f32 %v192_v30  ;;  %vm218_vm5 = vmor %vm216_vm4, %vm217_vm3  ;;  %v237_v47 = vand.u32 2147483648, %v192_v30  ;;  %v235_v50 = vand.u32 2147483647, %v192_v30  ;;  %vm231_vm8 = vweird.f32 %v192_v30 }
 0x112   : > { %v213_v32 = vsub.f32 1.0, %v212_v31  ;;  %463 = vpow2.f32 %v207_v29 }
 0x113   : > { %465 = vpow2.f32 %v209_v40  ;;  %v238_v54 = vor.u32 1.1754944e-38, %v237_v47  ;;  %vm236_vm10 = vcmp.eq.f32.partialorder %v235_v50, 8.507059e+37 }
 0x114   : > { %v214_v34 = vmul.f32 %v460_v28, %v213_v32  ;;  %467 = vlog2.f32 %v189_v26 }
 0x115   : > { %469 = vlog2.f32 %v192_v30 }
 0x116   : > { %v215_v37 = vadd.f32 %v460_v28, %v214_v34 }
 0x117   : > { %v462_v38 = vpop.eup %461 }
 0x118   : > { %v219_v41 = vsel %vm218_vm5, %v460_v28, %v215_v37  ;;  %v227_v42 = vmul.f32 %v462_v38, %v192_v30  ;;  %v464_v43 = vpop.eup %463  ;;  %vm232_vm7 = vweird.f32 %v462_v38 }
 0x119   : > { %v224_v44 = vsel %vm221_vm6, %v223_v39, %v219_v41  ;;  %vm233_vm9 = vmor %vm231_vm8, %vm232_vm7  ;;  %v466_v58 = vpop.eup %465 }
 0x11a   : > { %v225_v45 = vmul.f32 %v464_v43, %v224_v44  ;;  %v228_v46 = vsub.f32 1.0, %v227_v42  ;;  %v468_v6 = vpop.eup %467 }
 0x11b   : > { %v470_v7 = vpop.eup %469  ;;  %v202_v12 = vmul.f32 0.6931472, %v468_v6 }
 0x11c   : > { %v419_v48 = vadd.f32 -1.0, %v225_v45  ;;  %v229_v49 = vmul.f32 %v462_v38, %v228_v46  ;;  %v204_v13 = vmul.f32 0.6931472, %v470_v7 }
 0x11d   : > { %v205_v18 = vsub.f32 %v202_v12, %v564_v27 }
 0x11e   : > { %v243_v51 = vand.u32 2147483647, %v419_v48  ;;  %v230_v52 = vadd.f32 %v462_v38, %v229_v49  ;;  %v206_v19 = vsub.f32 %v204_v13, %v567_v36  ;;  %v282_v36 = vld [vmem:[#allocation3] sm:$0x1] }
 0x120   : > { %v245_v56 = vmul.f32 5.0, %v243_v51  ;;  %v234_v57 = vsel %vm233_vm9, %v462_v38, %v230_v52 }
 0x121   : > { %v239_v59 = vsel %vm236_vm10, %v238_v54, %v234_v57 }
 0x122   : > { %v247_v60 = vfloor.f32 %v245_v56  ;;  %v240_v61 = vmul.f32 %v466_v58, %v239_v59 }
 0x124   : > { %v431_v0 = vcvt.f32.s32 %v247_v60  ;;  %v420_v1 = vadd.f32 -1.0, %v240_v61 }
 0x126   : > { %vm251_vm11 = vcmp.lt.s32.totalorder %v431_v0, 4  ;;  %v244_v2 = vand.u32 2147483647, %v420_v1 }
 0x127   : > { %v252_v3 = vsel %vm251_vm11, %v431_v0, 4 }
 0x128   : > { %v246_v5 = vmul.f32 5.0, %v244_v2  ;;  %v264_v10 = vsel %vm262_vm12, %v252_v3, 4294967295 }
 0x129   : > { %vm266_vm14 = vcmp.eq.s32.totalorder %v556_v9, %v264_v10 }
 0x12a   : > { %v248_v8 = vfloor.f32 %v246_v5  ;;  %v422_v17 = vsel %vm266_vm14, 1.0, %v517_v16 }
 0x12b   : > { %v283_v22 = vmul.f32 %v422_v17, %v205_v18 }
 0x12c   : > { %v433_v11 = vcvt.f32.s32 %v248_v8 }
 0x12e   : > { %vm253_vm15 = vcmp.lt.s32.totalorder %v433_v11, 4 }
 0x12f   : > { %v254_v14 = vsel %vm253_vm15, %v433_v11, 4 }
 0x130   : > { %v265_v15 = vsel %vm263_vm13, %v254_v14, 4294967295 }
 0x131   : > { %vm267_vm0 = vcmp.eq.s32.totalorder %v556_v9, %v265_v15 }
 0x132   : > { %v423_v20 = vsel %vm267_vm0, 1.0, %v517_v16 }
 0x133   : > { %v273_v21 = vadd.f32 %v423_v20, %v422_v17  ;;  %v284_v23 = vmul.f32 %v423_v20, %v206_v19 }
 0x135   : > { %v274_v24 = vrot.slane %v273_v21, 4  ;;  %v285_v25 = vadd.f32 %v284_v23, %v283_v22 }
 0x137   : > { %v275_v26 = vadd.f32 %v274_v24, %v273_v21  ;;  %v286_v28 = vrot.slane %v285_v25, 4 }
 0x139   : > { %v276_v29 = vrot.slane %v275_v26, 2  ;;  %v287_v30 = vadd.f32 %v286_v28, %v285_v25 }
 0x13b   : > { %v277_v31 = vadd.f32 %v276_v29, %v275_v26  ;;  %v288_v32 = vrot.slane %v287_v30, 2 }
 0x13d   : > { %v278_v33 = vrot.slane %v277_v31, 1  ;;  %v289_v34 = vadd.f32 %v288_v32, %v287_v30 }
 0x13f   : > { %v279_v27 = vadd.f32 %v278_v33, %v277_v31  ;;  %v290_v37 = vrot.slane %v289_v34, 1 }
 0x141   : > { %v280_v38 = vadd.f32 %v279_v27, %v272_v35  ;;  %v291_v39 = vadd.f32 %v290_v37, %v289_v34  ;;  %297 = sbr.rel (%p424_p5) target bundleno = 474 (0x1da), region = 36 }
 0x143   : > { %281 = vst [vmem:[#allocation2] sm:$0x1] %v280_v38  ;;  %v292_v40 = vadd.f32 %v291_v39, %v282_v36 }
 0x145   : > { %293 = vst [vmem:[#allocation3] sm:$0x1] %v292_v40 }
 0x146   : > { %vm299_vm1 = vcmp.lt.s32.totalorder %v556_v9, 5  ;;  %vm304_vm3 = vcmask 1040384   ;;  %v518_v44 = vmov 0.0   ;;  %vm348_vm13 = vcmask 0  }
 0x14a   : > { %v298_v41 = vld [vmem:[#allocation2] sm:$0x1] }
 0x14b   : > { %vm300_vm2 = vcmp.gt.f32.partialorder %v298_v41, 0.0  ;;  %v308_v42 = vmax.f32 %v298_v41, 1.0 }
 0x14c   : > { %vm578_vm4 = vmand %vm299_vm1, %vm300_vm2  ;;  %v325_v55 = vld [vmem:[#allocation3] sm:$0x1] }
 0x14d   : > { %v425_v45 = vsel %vm578_vm4, 1.0, %v518_v44  ;;  %471 = vrcp.f32 %v308_v42  ;;  %v320_v49 = vand.u32 2147483648, %v308_v42  ;;  %vm314_vm5 = vweird.f32 %v308_v42 }
 0x14e   : > { %v305_v46 = vsel %vm304_vm3, %v425_v45, 0.0  ;;  %v318_v9 = vand.u32 2147483647, %v308_v42 }
 0x14f   : > { %306 = vadd.xlane.f32.xlu0 %v305_v46  ;;  %v321_v52 = vor.u32 1.1754944e-38, %v320_v49 }
 0x150   : > { %vm319_vm8 = vcmp.eq.f32.partialorder %v318_v9, 8.507059e+37 }
 0x153   : > { %v472_v47 = vpop.eup %471 }
 0x154   : > { %v310_v48 = vmul.f32 %v472_v47, %v308_v42  ;;  %vm315_vm6 = vweird.f32 %v472_v47 }
 0x155   : > { %vm316_vm7 = vmor %vm314_vm5, %vm315_vm6 }
 0x156   : > { %v311_v50 = vsub.f32 1.0, %v310_v48 }
 0x158   : > { %v312_v51 = vmul.f32 %v472_v47, %v311_v50 }
 0x15a   : > { %v313_v53 = vadd.f32 %v472_v47, %v312_v51 }
 0x15c   : > { %v317_v54 = vsel %vm316_vm7, %v472_v47, %v313_v53 }
 0x15d   : > { %v322_v56 = vsel %vm319_vm8, %v321_v52, %v317_v54 }
 0x15e   : > { %v324_v57 = vsel %vm578_vm4, %v322_v56, 0.0 }
 0x15f   : > { %v326_v58 = vmul.f32 %v325_v55, %v324_v57 }
 0x161   : > { %v327_v59 = vsel %vm304_vm3, %v326_v58, 0.0 }
 0x162   : > { %328 = vadd.xlane.f32.xlu0 %v327_v59 }
 0x1c2   : > { %v307_v60 = vpop.xlane.xlu0 %306 }
 0x1c3   : > { %v331_v61 = vmax.f32 %v307_v60, 1.0  ;;  %vm330_vm14 = vcmp.gt.f32.partialorder %v307_v60, 0.0 }
 0x1c5   : > { %473 = vrcp.f32 %v331_v61  ;;  %v343_v1 = vand.u32 2147483648, %v331_v61  ;;  %v341_v3 = vand.u32 2147483647, %v331_v61  ;;  %vm337_vm10 = vweird.f32 %v331_v61 }
 0x1c7   : > { %v344_v5 = vor.u32 1.1754944e-38, %v343_v1  ;;  %vm342_vm12 = vcmp.eq.f32.partialorder %v341_v3, 8.507059e+37 }
 0x1cb   : > { %v474_v62 = vpop.eup %473 }
 0x1cc   : > { %v333_v63 = vmul.f32 %v474_v62, %v331_v61  ;;  %vm338_vm9 = vweird.f32 %v474_v62 }
 0x1cd   : > { %vm339_vm11 = vmor %vm337_vm10, %vm338_vm9 }
 0x1ce   : > { %v334_v0 = vsub.f32 1.0, %v333_v63 }
 0x1d0   : > { %v335_v2 = vmul.f32 %v474_v62, %v334_v0 }
 0x1d2   : > { %v336_v4 = vadd.f32 %v474_v62, %v335_v2 }
 0x1d4   : > { %v340_v6 = vsel %vm339_vm11, %v474_v62, %v336_v4 }
 0x1d5   : > { %v345_v7 = vsel %vm342_vm12, %v344_v5, %v340_v6  ;;  %v329_v8 = vpop.xlane.xlu0 %328 }
 0x1d6   : > { %v346_v10 = vmul.f32 %v345_v7, %v329_v8 }
 0x1d8   : > { %v347_v11 = vsel %vm330_vm14, %v346_v10, 0.0 }
 0x1d9   : > { %349 = vst.msk [vmem:[#allocation4] sm:$0x1] %vm348_vm13, %v347_v11 }
 0x1da PF: > { %p438_p6 = scmp.eq.s32.totalorder %s541_s10, 1  ;;  %s519_s20 = smov [#allocation4]  }
 0x1db   : > { %s356_s21 = sshll.u32 %s519_s20, 4  ;;  %s358_s24 = sshll.u32 %s597_s2, 4  ;;  %s357_s21 = int_to_ptr.vmem [resolvable:$true] %s356_s21  ;;  %s359_s24 = int_to_ptr.hbm [resolvable:$true] %s358_s24 }
 0x1dc   : > { %435 = dma.vmem_to_hbm [thread:$0]  (%p438_p6), %s357_s21, 16, %s359_s24, [#allocation5]  }
 0x1dd   : > { %508 = dma.done.wait (%p438_p6), [#allocation5], 16  }
 0x1de   : > { %510 = vsyncadd (%p438_p6), [#allocation5], 4294967280 }
 0x1df PF: > { %s13_s9 = sadd.s32 1, %s513_s9  }
 0x1e0   : > { %p10_p7 = scmp.ge.s32.totalorder %s13_s9, 4  }
 0x1e2   :  { %12 = sbr.rel (!%p10_p7) target bundleno = 1 (0x1), region = 66 }
 0x1e7   :  { %372 = vsyncpa [#allocation5], 1 }
 0x1e8   :  { %374 = vsyncpa [#allocation5 + $0x1], 1 }

</bundles_post_ra>
